<compile_context>
chip_gen: v7x
topology: tpu7x:2x2x1
jax: 0.10.0
libtpu: 0.0.40
codegen_flags: <defaults>
</compile_context>

<pallas_src>
import numpy as np
import jax
import jax.numpy as jnp
from jax import lax
from jax.experimental import pallas as pl
from jax.experimental.pallas import tpu as pltpu

DT = 0.05
DELAY = 0  # delay == 0 branch of ss_init


def ss_init_tustin(dt):
    """Tustin (bilinear) discretization of the double integrator, as ctrl.sample_system would do."""
    A_c = np.array([[0.0, 1.0], [0.0, 0.0]])
    B_c = np.array([[0.0], [1.0]])
    C_c = np.eye(2)
    D_c = np.zeros((2, 1))
    I = np.eye(2)
    ima = I - 0.5 * dt * A_c
    Ad = np.linalg.solve(ima, I + 0.5 * dt * A_c)
    Bd = np.linalg.solve(ima, dt * B_c)
    Cd = np.linalg.solve(ima.T, C_c.T).T
    Dd = D_c + 0.5 * Cd @ B_c * dt  # unused in forward
    return Ad, Bd, Cd, Dd


def _sim_kernel(coef_ref, x0_ref, inp_ref, out_ref, pos_ref, vel_ref):
    """Single-invocation kernel: full time loop in-kernel, batch on the lane axis.

    coef_ref : SMEM (8,)  = [a11, a12, a21, a22, b1, b2, ga, gc]
    x0_ref   : VMEM (2, NB)        row 0 = position, row 1 = velocity
    inp_ref  : VMEM (NS, NB)       reference signal per step
    out_ref  : VMEM (NS, NB)       velocity/position ratio per step
    pos_ref  : VMEM (NS, NB)       raw state component 0 per step
    vel_ref  : VMEM (NS, NB)       raw state component 1 per step
    """
    n_steps = inp_ref.shape[0]

    # Discretized state-space + fused NN coefficients (scalars from SMEM).
    a11 = coef_ref[0]
    a12 = coef_ref[1]
    a21 = coef_ref[2]
    a22 = coef_ref[3]
    b1 = coef_ref[4]
    b2 = coef_ref[5]
    ga = coef_ref[6]
    gc = coef_ref[7]

    pos0 = x0_ref[0:1, :]                       # (1, NB)
    vel0 = x0_ref[1:2, :]                       # (1, NB)
    ratio0 = vel0 / pos0                        # (1, NB)

    def body(k, carry):
        pos, vel, ratio = carry
        r = inp_ref[pl.ds(k, 1), :]             # (1, NB)

        # GetNeuralInput + fused fc1/fc2:  u = ga * (r - vel/pos) + gc
        u = ga * (r - ratio) + gc               # (1, NB)

        # State update x_new = Ad @ x + Bd * u (row form, batch on lanes).
        pos_n = a11 * pos + a12 * vel + b1 * u
        vel_n = a21 * pos + a22 * vel + b2 * u
        ratio_n = vel_n / pos_n                 # computed once, reused next step

        out_ref[pl.ds(k, 1), :] = ratio_n
        pos_ref[pl.ds(k, 1), :] = pos_n
        vel_ref[pl.ds(k, 1), :] = vel_n
        return pos_n, vel_n, ratio_n

    unroll = True if n_steps <= 32 else 8
    lax.fori_loop(0, n_steps, body, (pos0, vel0, ratio0), unroll=unroll)


def run_simulation(inputs, x0, Ad, Bd, W1, b1, W2, b2):
    """inputs: (N_steps, NB, 1); x0: (NB, 2); W1:(H,1), b1:(H,), W2:(1,H), b2:(1,) (PyTorch layouts)."""
    n_steps, n_batch, _ = inputs.shape

    W1 = jnp.asarray(W1, jnp.float32)
    b1 = jnp.asarray(b1, jnp.float32)
    W2 = jnp.asarray(W2, jnp.float32)
    b2 = jnp.asarray(b2, jnp.float32)

    # Fuse fc2(fc1(x)) -> ga * x + gc  (no nonlinearity between the two linears).
    ga = (W2 @ W1).reshape(())                               # scalar gain
    gc = (W2 @ b1).reshape(()) + b2.reshape(())              # scalar offset

    Ad = np.asarray(Ad, np.float32)
    Bd = np.asarray(Bd, np.float32)
    coef = jnp.concatenate([
        jnp.array([Ad[0, 0], Ad[0, 1], Ad[1, 0], Ad[1, 1],
                   Bd[0, 0], Bd[1, 0]], jnp.float32),
        ga.astype(jnp.float32)[None],
        gc.astype(jnp.float32)[None],
    ])                                                        # (8,)

    x0_t = jnp.asarray(x0, jnp.float32).T                     # (2, NB)   batch on lanes
    inp2d = jnp.asarray(inputs, jnp.float32)[..., 0]          # (NS, NB)  batch on lanes

    out_shapes = (
        jax.ShapeDtypeStruct((n_steps, n_batch), jnp.float32),   # ratio
        jax.ShapeDtypeStruct((n_steps, n_batch), jnp.float32),   # state[0] (position)
        jax.ShapeDtypeStruct((n_steps, n_batch), jnp.float32),   # state[1] (velocity)
    )

    full2d = lambda i: (0, 0)
    outs, pos, vel = pl.pallas_call(
        _sim_kernel,
        out_shape=out_shapes,
        grid=(1,),
        in_specs=[
            pl.BlockSpec(memory_space=pltpu.MemorySpace.SMEM),     # coefficients
            pl.BlockSpec((2, n_batch), full2d),                    # x0 (2, NB)
            pl.BlockSpec((n_steps, n_batch), full2d),              # inputs (NS, NB)
        ],
        out_specs=(
            pl.BlockSpec((n_steps, n_batch), full2d),
            pl.BlockSpec((n_steps, n_batch), full2d),
            pl.BlockSpec((n_steps, n_batch), full2d),
        ),
        compiler_params=pltpu.CompilerParams(dimension_semantics=("arbitrary",)),
    )(coef, x0_t, inp2d)

    outputs = outs[..., None]                                  # (NS, NB, 1)
    outputs_extra = jnp.stack([pos, vel], axis=-1)             # (NS, NB, 2)
    return outputs, outputs_extra


def reference_simulation(inputs, x0, Ad, Bd, W1, b1, W2, b2):
    """Pure-JAX reference of the same forward pass (un-fused two-layer NN)."""
    AdT = jnp.asarray(Ad.T, jnp.float32)
    BdT = jnp.asarray(Bd.T, jnp.float32)
    W1 = jnp.asarray(W1, jnp.float32); b1 = jnp.asarray(b1, jnp.float32)
    W2 = jnp.asarray(W2, jnp.float32); b2 = jnp.asarray(b2, jnp.float32)

    def step(x, r):
        net_in = r - x[:, 1:2] / x[:, 0:1]
        h = net_in @ W1.T + b1
        u = h @ W2.T + b2
        x_new = x @ AdT + u @ BdT
        out = x_new[:, 1:2] / x_new[:, 0:1]
        return x_new, (out, x_new)

    _, (outs, extras) = jax.lax.scan(step, jnp.asarray(x0, jnp.float32),
                                     jnp.asarray(inputs, jnp.float32))
    return outs, extras


if __name__ == "__main__":
    N_STEPS, N_BATCH, HIDDEN = 8, 8, 20

    Ad, Bd, Cd, Dd = ss_init_tustin(DT)

    key = jax.random.PRNGKey(0)
    k_w1, k_b1, k_w2, k_b2, k_x0p, k_x0v, k_in = jax.random.split(key, 7)

    # Deterministic parameter init (PyTorch-like uniform).
    W1 = jax.random.uniform(k_w1, (HIDDEN, 1), jnp.float32, -1.0, 1.0)
    b1 = jax.random.uniform(k_b1, (HIDDEN,), jnp.float32, -1.0, 1.0)
    bound2 = 1.0 / np.sqrt(HIDDEN)
    W2 = jax.random.uniform(k_w2, (1, HIDDEN), jnp.float32, -bound2, bound2)
    b2 = jax.random.uniform(k_b2, (1,), jnp.float32, -bound2, bound2)

    # Initial state: position ~ 1 (well away from zero so the divide is safe), small velocity.
    x0 = jnp.stack(
        [1.0 + 0.1 * jax.random.uniform(k_x0p, (N_BATCH,), jnp.float32),
         0.1 * jax.random.normal(k_x0v, (N_BATCH,), jnp.float32)],
        axis=1,
    )
    inputs = 0.5 * jax.random.normal(k_in, (N_STEPS, N_BATCH, 1), jnp.float32)

    outs, extras = run_simulation(inputs, x0, Ad, Bd, W1, b1, W2, b2)
    outs = jax.block_until_ready(outs)
    extras = jax.block_until_ready(extras)

    ref_outs, ref_extras = reference_simulation(inputs, x0, Ad, Bd, W1, b1, W2, b2)
    np.testing.assert_allclose(np.asarray(outs), np.asarray(ref_outs), rtol=1e-3, atol=1e-4)
    np.testing.assert_allclose(np.asarray(extras), np.asarray(ref_extras), rtol=1e-3, atol=1e-4)

    print("KERNEL_OK")
</pallas_src>

<mosaic_0001>
module attributes {stable_mosaic.version = 11 : i64} {
  func.func @_sim_kernel(%arg0: i32, %arg1: memref<8xf32, #tpu.memory_space<smem>>, %arg2: memref<2x8xf32, #tpu.memory_space<vmem>>, %arg3: memref<8x8xf32, #tpu.memory_space<vmem>>, %arg4: memref<8x8xf32, #tpu.memory_space<vmem>>, %arg5: memref<8x8xf32, #tpu.memory_space<vmem>>, %arg6: memref<8x8xf32, #tpu.memory_space<vmem>>) attributes {dimension_semantics = [#tpu.dimension_semantics<arbitrary>], iteration_bounds = array<i64: 1>, scalar_prefetch = 0 : i64, scratch_operands = 0 : i64, tpu.core_type = #tpu.core_type<tc>, window_params = [{transform_indices = @transform_0, window_bounds = array<i64: 8>}, {pipeline_mode = #tpu.pipeline_mode<synchronous>, transform_indices = @transform_1, window_bounds = array<i64: 2, 8>}, {pipeline_mode = #tpu.pipeline_mode<synchronous>, transform_indices = @transform_2, window_bounds = array<i64: 8, 8>}, {pipeline_mode = #tpu.pipeline_mode<synchronous>, transform_indices = @transform_3, window_bounds = array<i64: 8, 8>}, {pipeline_mode = #tpu.pipeline_mode<synchronous>, transform_indices = @transform_4, window_bounds = array<i64: 8, 8>}, {pipeline_mode = #tpu.pipeline_mode<synchronous>, transform_indices = @transform_5, window_bounds = array<i64: 8, 8>}]} {
    %c0 = arith.constant 0 : index
    %0 = memref.load %arg1[%c0] : memref<8xf32, #tpu.memory_space<smem>>
    %c1 = arith.constant 1 : index
    %1 = memref.load %arg1[%c1] : memref<8xf32, #tpu.memory_space<smem>>
    %c2 = arith.constant 2 : index
    %2 = memref.load %arg1[%c2] : memref<8xf32, #tpu.memory_space<smem>>
    %c3 = arith.constant 3 : index
    %3 = memref.load %arg1[%c3] : memref<8xf32, #tpu.memory_space<smem>>
    %c4 = arith.constant 4 : index
    %4 = memref.load %arg1[%c4] : memref<8xf32, #tpu.memory_space<smem>>
    %c5 = arith.constant 5 : index
    %5 = memref.load %arg1[%c5] : memref<8xf32, #tpu.memory_space<smem>>
    %c6 = arith.constant 6 : index
    %6 = memref.load %arg1[%c6] : memref<8xf32, #tpu.memory_space<smem>>
    %c7 = arith.constant 7 : index
    %7 = memref.load %arg1[%c7] : memref<8xf32, #tpu.memory_space<smem>>
    %c0_0 = arith.constant 0 : index
    %c0_1 = arith.constant 0 : index
    %8 = vector.load %arg2[%c0_0, %c0_1] : memref<2x8xf32, #tpu.memory_space<vmem>>, vector<1x8xf32>
    %c1_2 = arith.constant 1 : index
    %c0_3 = arith.constant 0 : index
    %9 = vector.load %arg2[%c1_2, %c0_3] : memref<2x8xf32, #tpu.memory_space<vmem>>, vector<1x8xf32>
    %10 = arith.divf %9, %8 : vector<1x8xf32>
    %c0_i32 = arith.constant 0 : i32
    %11 = arith.index_cast %c0_i32 : i32 to index
    %c0_4 = arith.constant 0 : index
    %12 = vector.load %arg3[%11, %c0_4] : memref<8x8xf32, #tpu.memory_space<vmem>>, vector<1x8xf32>
    %13 = arith.subf %12, %10 : vector<1x8xf32>
    %14 = vector.broadcast %6 : f32 to vector<1x8xf32>
    %15 = arith.mulf %14, %13 : vector<1x8xf32>
    %16 = vector.broadcast %7 : f32 to vector<1x8xf32>
    %17 = arith.addf %15, %16 : vector<1x8xf32>
    %18 = vector.broadcast %0 : f32 to vector<1x8xf32>
    %19 = arith.mulf %18, %8 : vector<1x8xf32>
    %20 = vector.broadcast %1 : f32 to vector<1x8xf32>
    %21 = arith.mulf %20, %9 : vector<1x8xf32>
    %22 = arith.addf %19, %21 : vector<1x8xf32>
    %23 = vector.broadcast %4 : f32 to vector<1x8xf32>
    %24 = arith.mulf %23, %17 : vector<1x8xf32>
    %25 = arith.addf %22, %24 : vector<1x8xf32>
    %26 = vector.broadcast %2 : f32 to vector<1x8xf32>
    %27 = arith.mulf %26, %8 : vector<1x8xf32>
    %28 = vector.broadcast %3 : f32 to vector<1x8xf32>
    %29 = arith.mulf %28, %9 : vector<1x8xf32>
    %30 = arith.addf %27, %29 : vector<1x8xf32>
    %31 = vector.broadcast %5 : f32 to vector<1x8xf32>
    %32 = arith.mulf %31, %17 : vector<1x8xf32>
    %33 = arith.addf %30, %32 : vector<1x8xf32>
    %34 = arith.divf %33, %25 : vector<1x8xf32>
    %35 = arith.index_cast %c0_i32 : i32 to index
    %c0_5 = arith.constant 0 : index
    %36 = vector.load %arg4[%35, %c0_5] : memref<8x8xf32, #tpu.memory_space<vmem>>, vector<1x8xf32>
    tpu.vector_store %arg4[%35, %c0_5], %34 {strides = array<i32>} : memref<8x8xf32, #tpu.memory_space<vmem>>, vector<1x8xf32>,
    %37 = arith.index_cast %c0_i32 : i32 to index
    %c0_6 = arith.constant 0 : index
    %38 = vector.load %arg5[%37, %c0_6] : memref<8x8xf32, #tpu.memory_space<vmem>>, vector<1x8xf32>
    tpu.vector_store %arg5[%37, %c0_6], %25 {strides = array<i32>} : memref<8x8xf32, #tpu.memory_space<vmem>>, vector<1x8xf32>,
    %39 = arith.index_cast %c0_i32 : i32 to index
    %c0_7 = arith.constant 0 : index
    %40 = vector.load %arg6[%39, %c0_7] : memref<8x8xf32, #tpu.memory_space<vmem>>, vector<1x8xf32>
    tpu.vector_store %arg6[%39, %c0_7], %33 {strides = array<i32>} : memref<8x8xf32, #tpu.memory_space<vmem>>, vector<1x8xf32>,
    %c1_i32 = arith.constant 1 : i32
    %41 = arith.index_cast %c1_i32 : i32 to index
    %c0_8 = arith.constant 0 : index
    %42 = vector.load %arg3[%41, %c0_8] : memref<8x8xf32, #tpu.memory_space<vmem>>, vector<1x8xf32>
    %43 = arith.subf %42, %34 : vector<1x8xf32>
    %44 = vector.broadcast %6 : f32 to vector<1x8xf32>
    %45 = arith.mulf %44, %43 : vector<1x8xf32>
    %46 = vector.broadcast %7 : f32 to vector<1x8xf32>
    %47 = arith.addf %45, %46 : vector<1x8xf32>
    %48 = vector.broadcast %0 : f32 to vector<1x8xf32>
    %49 = arith.mulf %48, %25 : vector<1x8xf32>
    %50 = vector.broadcast %1 : f32 to vector<1x8xf32>
    %51 = arith.mulf %50, %33 : vector<1x8xf32>
    %52 = arith.addf %49, %51 : vector<1x8xf32>
    %53 = vector.broadcast %4 : f32 to vector<1x8xf32>
    %54 = arith.mulf %53, %47 : vector<1x8xf32>
    %55 = arith.addf %52, %54 : vector<1x8xf32>
    %56 = vector.broadcast %2 : f32 to vector<1x8xf32>
    %57 = arith.mulf %56, %25 : vector<1x8xf32>
    %58 = vector.broadcast %3 : f32 to vector<1x8xf32>
    %59 = arith.mulf %58, %33 : vector<1x8xf32>
    %60 = arith.addf %57, %59 : vector<1x8xf32>
    %61 = vector.broadcast %5 : f32 to vector<1x8xf32>
    %62 = arith.mulf %61, %47 : vector<1x8xf32>
    %63 = arith.addf %60, %62 : vector<1x8xf32>
    %64 = arith.divf %63, %55 : vector<1x8xf32>
    %65 = arith.index_cast %c1_i32 : i32 to index
    %c0_9 = arith.constant 0 : index
    %66 = vector.load %arg4[%65, %c0_9] : memref<8x8xf32, #tpu.memory_space<vmem>>, vector<1x8xf32>
    tpu.vector_store %arg4[%65, %c0_9], %64 {strides = array<i32>} : memref<8x8xf32, #tpu.memory_space<vmem>>, vector<1x8xf32>,
    %67 = arith.index_cast %c1_i32 : i32 to index
    %c0_10 = arith.constant 0 : index
    %68 = vector.load %arg5[%67, %c0_10] : memref<8x8xf32, #tpu.memory_space<vmem>>, vector<1x8xf32>
    tpu.vector_store %arg5[%67, %c0_10], %55 {strides = array<i32>} : memref<8x8xf32, #tpu.memory_space<vmem>>, vector<1x8xf32>,
    %69 = arith.index_cast %c1_i32 : i32 to index
    %c0_11 = arith.constant 0 : index
    %70 = vector.load %arg6[%69, %c0_11] : memref<8x8xf32, #tpu.memory_space<vmem>>, vector<1x8xf32>
    tpu.vector_store %arg6[%69, %c0_11], %63 {strides = array<i32>} : memref<8x8xf32, #tpu.memory_space<vmem>>, vector<1x8xf32>,
    %c2_i32 = arith.constant 2 : i32
    %71 = arith.index_cast %c2_i32 : i32 to index
    %c0_12 = arith.constant 0 : index
    %72 = vector.load %arg3[%71, %c0_12] : memref<8x8xf32, #tpu.memory_space<vmem>>, vector<1x8xf32>
    %73 = arith.subf %72, %64 : vector<1x8xf32>
    %74 = vector.broadcast %6 : f32 to vector<1x8xf32>
    %75 = arith.mulf %74, %73 : vector<1x8xf32>
    %76 = vector.broadcast %7 : f32 to vector<1x8xf32>
    %77 = arith.addf %75, %76 : vector<1x8xf32>
    %78 = vector.broadcast %0 : f32 to vector<1x8xf32>
    %79 = arith.mulf %78, %55 : vector<1x8xf32>
    %80 = vector.broadcast %1 : f32 to vector<1x8xf32>
    %81 = arith.mulf %80, %63 : vector<1x8xf32>
    %82 = arith.addf %79, %81 : vector<1x8xf32>
    %83 = vector.broadcast %4 : f32 to vector<1x8xf32>
    %84 = arith.mulf %83, %77 : vector<1x8xf32>
    %85 = arith.addf %82, %84 : vector<1x8xf32>
    %86 = vector.broadcast %2 : f32 to vector<1x8xf32>
    %87 = arith.mulf %86, %55 : vector<1x8xf32>
    %88 = vector.broadcast %3 : f32 to vector<1x8xf32>
    %89 = arith.mulf %88, %63 : vector<1x8xf32>
    %90 = arith.addf %87, %89 : vector<1x8xf32>
    %91 = vector.broadcast %5 : f32 to vector<1x8xf32>
    %92 = arith.mulf %91, %77 : vector<1x8xf32>
    %93 = arith.addf %90, %92 : vector<1x8xf32>
    %94 = arith.divf %93, %85 : vector<1x8xf32>
    %95 = arith.index_cast %c2_i32 : i32 to index
    %c0_13 = arith.constant 0 : index
    %96 = vector.load %arg4[%95, %c0_13] : memref<8x8xf32, #tpu.memory_space<vmem>>, vector<1x8xf32>
    tpu.vector_store %arg4[%95, %c0_13], %94 {strides = array<i32>} : memref<8x8xf32, #tpu.memory_space<vmem>>, vector<1x8xf32>,
    %97 = arith.index_cast %c2_i32 : i32 to index
    %c0_14 = arith.constant 0 : index
    %98 = vector.load %arg5[%97, %c0_14] : memref<8x8xf32, #tpu.memory_space<vmem>>, vector<1x8xf32>
    tpu.vector_store %arg5[%97, %c0_14], %85 {strides = array<i32>} : memref<8x8xf32, #tpu.memory_space<vmem>>, vector<1x8xf32>,
    %99 = arith.index_cast %c2_i32 : i32 to index
    %c0_15 = arith.constant 0 : index
    %100 = vector.load %arg6[%99, %c0_15] : memref<8x8xf32, #tpu.memory_space<vmem>>, vector<1x8xf32>
    tpu.vector_store %arg6[%99, %c0_15], %93 {strides = array<i32>} : memref<8x8xf32, #tpu.memory_space<vmem>>, vector<1x8xf32>,
    %c3_i32 = arith.constant 3 : i32
    %101 = arith.index_cast %c3_i32 : i32 to index
    %c0_16 = arith.constant 0 : index
    %102 = vector.load %arg3[%101, %c0_16] : memref<8x8xf32, #tpu.memory_space<vmem>>, vector<1x8xf32>
    %103 = arith.subf %102, %94 : vector<1x8xf32>
    %104 = vector.broadcast %6 : f32 to vector<1x8xf32>
    %105 = arith.mulf %104, %103 : vector<1x8xf32>
    %106 = vector.broadcast %7 : f32 to vector<1x8xf32>
    %107 = arith.addf %105, %106 : vector<1x8xf32>
    %108 = vector.broadcast %0 : f32 to vector<1x8xf32>
    %109 = arith.mulf %108, %85 : vector<1x8xf32>
    %110 = vector.broadcast %1 : f32 to vector<1x8xf32>
    %111 = arith.mulf %110, %93 : vector<1x8xf32>
    %112 = arith.addf %109, %111 : vector<1x8xf32>
    %113 = vector.broadcast %4 : f32 to vector<1x8xf32>
    %114 = arith.mulf %113, %107 : vector<1x8xf32>
    %115 = arith.addf %112, %114 : vector<1x8xf32>
    %116 = vector.broadcast %2 : f32 to vector<1x8xf32>
    %117 = arith.mulf %116, %85 : vector<1x8xf32>
    %118 = vector.broadcast %3 : f32 to vector<1x8xf32>
    %119 = arith.mulf %118, %93 : vector<1x8xf32>
    %120 = arith.addf %117, %119 : vector<1x8xf32>
    %121 = vector.broadcast %5 : f32 to vector<1x8xf32>
    %122 = arith.mulf %121, %107 : vector<1x8xf32>
    %123 = arith.addf %120, %122 : vector<1x8xf32>
    %124 = arith.divf %123, %115 : vector<1x8xf32>
    %125 = arith.index_cast %c3_i32 : i32 to index
    %c0_17 = arith.constant 0 : index
    %126 = vector.load %arg4[%125, %c0_17] : memref<8x8xf32, #tpu.memory_space<vmem>>, vector<1x8xf32>
    tpu.vector_store %arg4[%125, %c0_17], %124 {strides = array<i32>} : memref<8x8xf32, #tpu.memory_space<vmem>>, vector<1x8xf32>,
    %127 = arith.index_cast %c3_i32 : i32 to index
    %c0_18 = arith.constant 0 : index
    %128 = vector.load %arg5[%127, %c0_18] : memref<8x8xf32, #tpu.memory_space<vmem>>, vector<1x8xf32>
    tpu.vector_store %arg5[%127, %c0_18], %115 {strides = array<i32>} : memref<8x8xf32, #tpu.memory_space<vmem>>, vector<1x8xf32>,
    %129 = arith.index_cast %c3_i32 : i32 to index
    %c0_19 = arith.constant 0 : index
    %130 = vector.load %arg6[%129, %c0_19] : memref<8x8xf32, #tpu.memory_space<vmem>>, vector<1x8xf32>
    tpu.vector_store %arg6[%129, %c0_19], %123 {strides = array<i32>} : memref<8x8xf32, #tpu.memory_space<vmem>>, vector<1x8xf32>,
    %c4_i32 = arith.constant 4 : i32
    %131 = arith.index_cast %c4_i32 : i32 to index
    %c0_20 = arith.constant 0 : index
    %132 = vector.load %arg3[%131, %c0_20] : memref<8x8xf32, #tpu.memory_space<vmem>>, vector<1x8xf32>
    %133 = arith.subf %132, %124 : vector<1x8xf32>
    %134 = vector.broadcast %6 : f32 to vector<1x8xf32>
    %135 = arith.mulf %134, %133 : vector<1x8xf32>
    %136 = vector.broadcast %7 : f32 to vector<1x8xf32>
    %137 = arith.addf %135, %136 : vector<1x8xf32>
    %138 = vector.broadcast %0 : f32 to vector<1x8xf32>
    %139 = arith.mulf %138, %115 : vector<1x8xf32>
    %140 = vector.broadcast %1 : f32 to vector<1x8xf32>
    %141 = arith.mulf %140, %123 : vector<1x8xf32>
    %142 = arith.addf %139, %141 : vector<1x8xf32>
    %143 = vector.broadcast %4 : f32 to vector<1x8xf32>
    %144 = arith.mulf %143, %137 : vector<1x8xf32>
    %145 = arith.addf %142, %144 : vector<1x8xf32>
    %146 = vector.broadcast %2 : f32 to vector<1x8xf32>
    %147 = arith.mulf %146, %115 : vector<1x8xf32>
    %148 = vector.broadcast %3 : f32 to vector<1x8xf32>
    %149 = arith.mulf %148, %123 : vector<1x8xf32>
    %150 = arith.addf %147, %149 : vector<1x8xf32>
    %151 = vector.broadcast %5 : f32 to vector<1x8xf32>
    %152 = arith.mulf %151, %137 : vector<1x8xf32>
    %153 = arith.addf %150, %152 : vector<1x8xf32>
    %154 = arith.divf %153, %145 : vector<1x8xf32>
    %155 = arith.index_cast %c4_i32 : i32 to index
    %c0_21 = arith.constant 0 : index
    %156 = vector.load %arg4[%155, %c0_21] : memref<8x8xf32, #tpu.memory_space<vmem>>, vector<1x8xf32>
    tpu.vector_store %arg4[%155, %c0_21], %154 {strides = array<i32>} : memref<8x8xf32, #tpu.memory_space<vmem>>, vector<1x8xf32>,
    %157 = arith.index_cast %c4_i32 : i32 to index
    %c0_22 = arith.constant 0 : index
    %158 = vector.load %arg5[%157, %c0_22] : memref<8x8xf32, #tpu.memory_space<vmem>>, vector<1x8xf32>
    tpu.vector_store %arg5[%157, %c0_22], %145 {strides = array<i32>} : memref<8x8xf32, #tpu.memory_space<vmem>>, vector<1x8xf32>,
    %159 = arith.index_cast %c4_i32 : i32 to index
    %c0_23 = arith.constant 0 : index
    %160 = vector.load %arg6[%159, %c0_23] : memref<8x8xf32, #tpu.memory_space<vmem>>, vector<1x8xf32>
    tpu.vector_store %arg6[%159, %c0_23], %153 {strides = array<i32>} : memref<8x8xf32, #tpu.memory_space<vmem>>, vector<1x8xf32>,
    %c5_i32 = arith.constant 5 : i32
    %161 = arith.index_cast %c5_i32 : i32 to index
    %c0_24 = arith.constant 0 : index
    %162 = vector.load %arg3[%161, %c0_24] : memref<8x8xf32, #tpu.memory_space<vmem>>, vector<1x8xf32>
    %163 = arith.subf %162, %154 : vector<1x8xf32>
    %164 = vector.broadcast %6 : f32 to vector<1x8xf32>
    %165 = arith.mulf %164, %163 : vector<1x8xf32>
    %166 = vector.broadcast %7 : f32 to vector<1x8xf32>
    %167 = arith.addf %165, %166 : vector<1x8xf32>
    %168 = vector.broadcast %0 : f32 to vector<1x8xf32>
    %169 = arith.mulf %168, %145 : vector<1x8xf32>
    %170 = vector.broadcast %1 : f32 to vector<1x8xf32>
    %171 = arith.mulf %170, %153 : vector<1x8xf32>
    %172 = arith.addf %169, %171 : vector<1x8xf32>
    %173 = vector.broadcast %4 : f32 to vector<1x8xf32>
    %174 = arith.mulf %173, %167 : vector<1x8xf32>
    %175 = arith.addf %172, %174 : vector<1x8xf32>
    %176 = vector.broadcast %2 : f32 to vector<1x8xf32>
    %177 = arith.mulf %176, %145 : vector<1x8xf32>
    %178 = vector.broadcast %3 : f32 to vector<1x8xf32>
    %179 = arith.mulf %178, %153 : vector<1x8xf32>
    %180 = arith.addf %177, %179 : vector<1x8xf32>
    %181 = vector.broadcast %5 : f32 to vector<1x8xf32>
    %182 = arith.mulf %181, %167 : vector<1x8xf32>
    %183 = arith.addf %180, %182 : vector<1x8xf32>
    %184 = arith.divf %183, %175 : vector<1x8xf32>
    %185 = arith.index_cast %c5_i32 : i32 to index
    %c0_25 = arith.constant 0 : index
    %186 = vector.load %arg4[%185, %c0_25] : memref<8x8xf32, #tpu.memory_space<vmem>>, vector<1x8xf32>
    tpu.vector_store %arg4[%185, %c0_25], %184 {strides = array<i32>} : memref<8x8xf32, #tpu.memory_space<vmem>>, vector<1x8xf32>,
    %187 = arith.index_cast %c5_i32 : i32 to index
    %c0_26 = arith.constant 0 : index
    %188 = vector.load %arg5[%187, %c0_26] : memref<8x8xf32, #tpu.memory_space<vmem>>, vector<1x8xf32>
    tpu.vector_store %arg5[%187, %c0_26], %175 {strides = array<i32>} : memref<8x8xf32, #tpu.memory_space<vmem>>, vector<1x8xf32>,
    %189 = arith.index_cast %c5_i32 : i32 to index
    %c0_27 = arith.constant 0 : index
    %190 = vector.load %arg6[%189, %c0_27] : memref<8x8xf32, #tpu.memory_space<vmem>>, vector<1x8xf32>
    tpu.vector_store %arg6[%189, %c0_27], %183 {strides = array<i32>} : memref<8x8xf32, #tpu.memory_space<vmem>>, vector<1x8xf32>,
    %c6_i32 = arith.constant 6 : i32
    %191 = arith.index_cast %c6_i32 : i32 to index
    %c0_28 = arith.constant 0 : index
    %192 = vector.load %arg3[%191, %c0_28] : memref<8x8xf32, #tpu.memory_space<vmem>>, vector<1x8xf32>
    %193 = arith.subf %192, %184 : vector<1x8xf32>
    %194 = vector.broadcast %6 : f32 to vector<1x8xf32>
    %195 = arith.mulf %194, %193 : vector<1x8xf32>
    %196 = vector.broadcast %7 : f32 to vector<1x8xf32>
    %197 = arith.addf %195, %196 : vector<1x8xf32>
    %198 = vector.broadcast %0 : f32 to vector<1x8xf32>
    %199 = arith.mulf %198, %175 : vector<1x8xf32>
    %200 = vector.broadcast %1 : f32 to vector<1x8xf32>
    %201 = arith.mulf %200, %183 : vector<1x8xf32>
    %202 = arith.addf %199, %201 : vector<1x8xf32>
    %203 = vector.broadcast %4 : f32 to vector<1x8xf32>
    %204 = arith.mulf %203, %197 : vector<1x8xf32>
    %205 = arith.addf %202, %204 : vector<1x8xf32>
    %206 = vector.broadcast %2 : f32 to vector<1x8xf32>
    %207 = arith.mulf %206, %175 : vector<1x8xf32>
    %208 = vector.broadcast %3 : f32 to vector<1x8xf32>
    %209 = arith.mulf %208, %183 : vector<1x8xf32>
    %210 = arith.addf %207, %209 : vector<1x8xf32>
    %211 = vector.broadcast %5 : f32 to vector<1x8xf32>
    %212 = arith.mulf %211, %197 : vector<1x8xf32>
    %213 = arith.addf %210, %212 : vector<1x8xf32>
    %214 = arith.divf %213, %205 : vector<1x8xf32>
    %215 = arith.index_cast %c6_i32 : i32 to index
    %c0_29 = arith.constant 0 : index
    %216 = vector.load %arg4[%215, %c0_29] : memref<8x8xf32, #tpu.memory_space<vmem>>, vector<1x8xf32>
    tpu.vector_store %arg4[%215, %c0_29], %214 {strides = array<i32>} : memref<8x8xf32, #tpu.memory_space<vmem>>, vector<1x8xf32>,
    %217 = arith.index_cast %c6_i32 : i32 to index
    %c0_30 = arith.constant 0 : index
    %218 = vector.load %arg5[%217, %c0_30] : memref<8x8xf32, #tpu.memory_space<vmem>>, vector<1x8xf32>
    tpu.vector_store %arg5[%217, %c0_30], %205 {strides = array<i32>} : memref<8x8xf32, #tpu.memory_space<vmem>>, vector<1x8xf32>,
    %219 = arith.index_cast %c6_i32 : i32 to index
    %c0_31 = arith.constant 0 : index
    %220 = vector.load %arg6[%219, %c0_31] : memref<8x8xf32, #tpu.memory_space<vmem>>, vector<1x8xf32>
    tpu.vector_store %arg6[%219, %c0_31], %213 {strides = array<i32>} : memref<8x8xf32, #tpu.memory_space<vmem>>, vector<1x8xf32>,
    %c7_i32 = arith.constant 7 : i32
    %221 = arith.index_cast %c7_i32 : i32 to index
    %c0_32 = arith.constant 0 : index
    %222 = vector.load %arg3[%221, %c0_32] : memref<8x8xf32, #tpu.memory_space<vmem>>, vector<1x8xf32>
    %223 = arith.subf %222, %214 : vector<1x8xf32>
    %224 = vector.broadcast %6 : f32 to vector<1x8xf32>
    %225 = arith.mulf %224, %223 : vector<1x8xf32>
    %226 = vector.broadcast %7 : f32 to vector<1x8xf32>
    %227 = arith.addf %225, %226 : vector<1x8xf32>
    %228 = vector.broadcast %0 : f32 to vector<1x8xf32>
    %229 = arith.mulf %228, %205 : vector<1x8xf32>
    %230 = vector.broadcast %1 : f32 to vector<1x8xf32>
    %231 = arith.mulf %230, %213 : vector<1x8xf32>
    %232 = arith.addf %229, %231 : vector<1x8xf32>
    %233 = vector.broadcast %4 : f32 to vector<1x8xf32>
    %234 = arith.mulf %233, %227 : vector<1x8xf32>
    %235 = arith.addf %232, %234 : vector<1x8xf32>
    %236 = vector.broadcast %2 : f32 to vector<1x8xf32>
    %237 = arith.mulf %236, %205 : vector<1x8xf32>
    %238 = vector.broadcast %3 : f32 to vector<1x8xf32>
    %239 = arith.mulf %238, %213 : vector<1x8xf32>
    %240 = arith.addf %237, %239 : vector<1x8xf32>
    %241 = vector.broadcast %5 : f32 to vector<1x8xf32>
    %242 = arith.mulf %241, %227 : vector<1x8xf32>
    %243 = arith.addf %240, %242 : vector<1x8xf32>
    %244 = arith.divf %243, %235 : vector<1x8xf32>
    %245 = arith.index_cast %c7_i32 : i32 to index
    %c0_33 = arith.constant 0 : index
    %246 = vector.load %arg4[%245, %c0_33] : memref<8x8xf32, #tpu.memory_space<vmem>>, vector<1x8xf32>
    tpu.vector_store %arg4[%245, %c0_33], %244 {strides = array<i32>} : memref<8x8xf32, #tpu.memory_space<vmem>>, vector<1x8xf32>,
    %247 = arith.index_cast %c7_i32 : i32 to index
    %c0_34 = arith.constant 0 : index
    %248 = vector.load %arg5[%247, %c0_34] : memref<8x8xf32, #tpu.memory_space<vmem>>, vector<1x8xf32>
    tpu.vector_store %arg5[%247, %c0_34], %235 {strides = array<i32>} : memref<8x8xf32, #tpu.memory_space<vmem>>, vector<1x8xf32>,
    %249 = arith.index_cast %c7_i32 : i32 to index
    %c0_35 = arith.constant 0 : index
    %250 = vector.load %arg6[%249, %c0_35] : memref<8x8xf32, #tpu.memory_space<vmem>>, vector<1x8xf32>
    tpu.vector_store %arg6[%249, %c0_35], %243 {strides = array<i32>} : memref<8x8xf32, #tpu.memory_space<vmem>>, vector<1x8xf32>,
    %c8_i32 = arith.constant 8 : i32
    return
  }
  func.func @transform_0(%arg0: i32) -> i32 {
    %c0_i32 = arith.constant 0 : i32
    %c0_i32_0 = arith.constant 0 : i32
    return %c0_i32 : i32
  }
  func.func @transform_1(%arg0: i32) -> (i32, i32) {
    %c0_i32 = arith.constant 0 : i32
    %c0_i32_0 = arith.constant 0 : i32
    %c0_i32_1 = arith.constant 0 : i32
    return %c0_i32, %c0_i32_0 : i32, i32
  }
  func.func @transform_2(%arg0: i32) -> (i32, i32) {
    %c0_i32 = arith.constant 0 : i32
    %c0_i32_0 = arith.constant 0 : i32
    %c0_i32_1 = arith.constant 0 : i32
    return %c0_i32, %c0_i32_0 : i32, i32
  }
  func.func @transform_3(%arg0: i32) -> (i32, i32) {
    %c0_i32 = arith.constant 0 : i32
    %c0_i32_0 = arith.constant 0 : i32
    %c0_i32_1 = arith.constant 0 : i32
    return %c0_i32, %c0_i32_0 : i32, i32
  }
  func.func @transform_4(%arg0: i32) -> (i32, i32) {
    %c0_i32 = arith.constant 0 : i32
    %c0_i32_0 = arith.constant 0 : i32
    %c0_i32_1 = arith.constant 0 : i32
    return %c0_i32, %c0_i32_0 : i32, i32
  }
  func.func @transform_5(%arg0: i32) -> (i32, i32) {
    %c0_i32 = arith.constant 0 : i32
    %c0_i32_0 = arith.constant 0 : i32
    %c0_i32_1 = arith.constant 0 : i32
    return %c0_i32, %c0_i32_0 : i32, i32
  }
}

</mosaic_0001>

<bundles_post_ra>
// kernel: tpu_custom_call.1
= control target key start
LH: loop header
LB: loop body
LE: loop exit
PB: predicated region body
PF: predicated region fallthrough
CT: control target
= control target key end

     0   :  { %11 = vsyncpa [#allocation5], 0  ;;  %s606_s0 = inlined_call_operand.hbm [shape: f32[8], index: 0, kind: input, shape index: {}]   ;;  %s607_s1 = inlined_call_operand.vmem [shape: f32[2,8], index: 1, kind: input, shape index: {}]   ;;  %s608_s2 = inlined_call_operand.hbm [shape: f32[8,8], index: 2, kind: input, shape index: {}]   ;;  %s609_s3 = inlined_call_operand.hbm [shape: f32[8,8], index: 3, kind: output, shape index: {0}]   ;;  %s610_s4 = inlined_call_operand.hbm [shape: f32[8,8], index: 4, kind: output, shape index: {1}]   ;;  %s611_s5 = inlined_call_operand.hbm [shape: f32[8,8], index: 5, kind: output, shape index: {2}]  }
   0x1   :  { %12 = vsyncpa [#allocation3], 0 }
   0x2   :  { %13 = vsyncpa [#allocation4], 0 }
   0x3   :  { %14 = vsyncpa [#allocation9], 0  ;;  %s288_s20 = scalar_lea.hbm %s606_s0, 16 }
   0x4   :  { %p289_p0 = scmp.ne.s32.totalorder %s606_s0, %s288_s20  ;;  %p292_p1 = scmp.lt.u32.totalorder %s288_s20, %s606_s0 }
   0x6   :  { %p294_p2 = pnand %p292_p1, %p289_p0 }
   0x8   :  { %297 = shalt.err (!%p294_p2)
}
   0x9   :  { %s394_s25 = smov [#allocation2]   ;;  %s395_s28 = smov [#allocation6]  }
   0xa   :  { %22 = dma.hbm_to_smem %s606_s0, 16, %s394_s25, [#allocation5]  }
   0xb   :  { %s31_s29 = sshll.u32 %s395_s28, 4  ;;  %s298_s7 = scalar_lea.hbm %s608_s2, 128  ;;  %s32_s29 = int_to_ptr.vmem [resolvable:$true] %s31_s29 }
   0xc   :  { %p299_p3 = scmp.ne.s32.totalorder %s608_s2, %s298_s7  ;;  %p302_p4 = scmp.lt.u32.totalorder %s298_s7, %s608_s2 }
   0xe   :  { %p304_p5 = pnand %p302_p4, %p299_p3 }
  0x10   :  { %307 = shalt.err (!%p304_p5)
}
  0x11   :  { %s308_s12 = scalar_lea.vmem %s32_s29, 128  ;;  %p313_p7 = scmp.lt.s32.totalorder %s32_s29, %s32_s29 }
  0x12   :  { %p309_p6 = scmp.ne.s32.totalorder %s32_s29, %s308_s12  ;;  %p314_p8 = scmp.lt.s32.totalorder %s308_s12, %s308_s12 }
  0x14   :  { %p315_p9 = por %p314_p8, %p313_p7 }
  0x16   :  { %p316_p10 = pnand %p315_p9, %p309_p6 }
  0x18   :  { %319 = shalt.err (!%p316_p10)
}
  0x19   :  { %34 = dma.hbm_to_vmem [thread:$0]  %s608_s2, 128, %s32_s29, [#allocation3]  }
  0x1a   :  { %386 = dma.done.wait [#allocation5], 16  }
  0x1b   :  { %387 = vsyncadd [#allocation5], 4294967280 }
  0x1c   :  { %388 = dma.done.wait [#allocation3], 128  }
  0x1d   :  { %389 = vsyncadd [#allocation3], 4294967168 }
  0x1e   :  { %41 = sfence }
  0x1f   :  { %v50_v0 = vld [vmem:[%s607_s1] sm:$0x1]  ;;  %s42_s16 = sld [smem:[#allocation2]]  ;;  %s258_s17 = sld [smem:[#allocation2 + $0x1]]  ;;  %v51_v1 = vld [vmem:[%s607_s1 + $0x1] sm:$0x1] }
  0x20   :  { %270 = vrcp.f32 %v50_v0  ;;  %s259_s18 = sld [smem:[#allocation2 + $0x2]]  ;;  %s260_s19 = sld [smem:[#allocation2 + $0x3]]  ;;  %v54_v4 = vld [vmem:[#allocation6] sm:$0x1]  ;;  %vm78_vm0 = vcmask 57344  }
  0x21   :  { %s263_s20 = sld [smem:[#allocation2 + $0x6]]  ;;  %s264_s21 = sld [smem:[#allocation2 + $0x7]]  ;;  %v82_v27 = vld [vmem:[#allocation6 + $0x1] sm:$0x1]  ;;  %v101_v43 = vld [vmem:[#allocation6 + $0x2] sm:$0x1] }
  0x22   :  { %s261_s22 = sld [smem:[#allocation2 + $0x4]]  ;;  %s262_s23 = sld [smem:[#allocation2 + $0x5]]  ;;  %v120_v59 = vld [vmem:[#allocation6 + $0x3] sm:$0x1] }
  0x23   :  { %s396_s1 = smov [#allocation8]   ;;  %s397_s26 = smov [#allocation10]  }
  0x24   :  { %s231_s25 = sshll.u32 %s396_s1, 4  ;;  %s241_s27 = sshll.u32 %s397_s26, 4  ;;  %s232_s25 = int_to_ptr.vmem [resolvable:$true] %s231_s25  ;;  %s560_s27 = int_to_ptr.vmem [resolvable:$true] %s241_s27 }
  0x25   :  { %v459_v2 = vstv %s42_s16  ;;  %v461_v5 = vstv %s258_s17  ;;  %s320_s28 = scalar_lea.vmem %s232_s25, 128  ;;  %p325_p12 = scmp.lt.s32.totalorder %s232_s25, %s232_s25 }
  0x26   :  { %v463_v6 = vstv %s259_s18  ;;  %v465_v7 = vstv %s260_s19  ;;  %v61_v10 = vmul.f32 %v459_v2, %v50_v0  ;;  %v63_v12 = vmul.f32 %v461_v5, %v51_v1  ;;  %p321_p11 = scmp.ne.s32.totalorder %s232_s25, %s320_s28  ;;  %p326_p13 = scmp.lt.s32.totalorder %s320_s28, %s320_s28 }
  0x27   :  { %v467_v9 = vstv %s263_s20  ;;  %v69_v13 = vmul.f32 %v463_v6, %v50_v0  ;;  %v71_v14 = vmul.f32 %v465_v7, %v51_v1  ;;  %v473_v15 = vstv %s264_s21 }
  0x28   :  { %v476_v17 = vstv %s261_s22  ;;  %v478_v18 = vstv %s262_s23  ;;  %v64_v20 = vadd.f32 %v63_v12, %v61_v10  ;;  %p327_p0 = por %p326_p13, %p325_p12 }
  0x29   :  { %v72_v21 = vadd.f32 %v71_v14, %v69_v13 }
  0x2a   :  { %v271_v3 = vpop.eup %270  ;;  %p328_p1 = pnand %p327_p0, %p321_p11 }
  0x2b   :  { %v53_v8 = vmul.f32 %v271_v3, %v51_v1 }
  0x2d   :  { %v55_v11 = vsub.f32 %v54_v4, %v53_v8 }
  0x2f   :  { %v57_v16 = vmul.f32 %v467_v9, %v55_v11 }
  0x31   :  { %v59_v19 = vadd.f32 %v473_v15, %v57_v16 }
  0x33   :  { %v66_v22 = vmul.f32 %v476_v17, %v59_v19  ;;  %v74_v23 = vmul.f32 %v478_v18, %v59_v19  ;;  %v139_v19 = vld [vmem:[#allocation6 + $0x4] sm:$0x1] }
  0x35   :  { %v67_v24 = vadd.f32 %v66_v22, %v64_v20  ;;  %v75_v25 = vadd.f32 %v74_v23, %v72_v21 }
  0x37   :  { %272 = vrcp.f32 %v67_v24  ;;  %80 = vst.msk [vmem:[#allocation8] sm:$0x1] %vm78_vm0, %v67_v24  ;;  %81 = vst.msk [vmem:[#allocation10] sm:$0x1] %vm78_vm0, %v75_v25  ;;  %v91_v29 = vmul.f32 %v463_v6, %v67_v24  ;;  %v86_v31 = vmul.f32 %v67_v24, %v459_v2  ;;  %v87_v32 = vmul.f32 %v75_v25, %v461_v5 }
  0x38   :  { %v92_v33 = vmul.f32 %v75_v25, %v465_v7 }
  0x39   :  { %v88_v36 = vadd.f32 %v87_v32, %v86_v31 }
  0x3a   :  { %v93_v37 = vadd.f32 %v92_v33, %v91_v29 }
  0x41   :  { %v273_v26 = vpop.eup %272 }
  0x42   :  { %v77_v28 = vmul.f32 %v273_v26, %v75_v25 }
  0x44   :  { %v83_v30 = vsub.f32 %v82_v27, %v77_v28  ;;  %79 = vst.msk [vmem:[#allocation7] sm:$0x1] %vm78_vm0, %v77_v28 }
  0x46   :  { %v84_v34 = vmul.f32 %v83_v30, %v467_v9 }
  0x48   :  { %v85_v35 = vadd.f32 %v84_v34, %v473_v15 }
  0x4a   :  { %v89_v38 = vmul.f32 %v85_v35, %v476_v17  ;;  %v94_v39 = vmul.f32 %v85_v35, %v478_v18  ;;  %v158_v35 = vld [vmem:[#allocation6 + $0x5] sm:$0x1] }
  0x4c   :  { %v90_v40 = vadd.f32 %v89_v38, %v88_v36  ;;  %v95_v41 = vadd.f32 %v94_v39, %v93_v37 }
  0x4e   :  { %274 = vrcp.f32 %v90_v40  ;;  %99 = vst.msk [vmem:[#allocation8 + $0x1] sm:$0x1] %vm78_vm0, %v90_v40  ;;  %100 = vst.msk [vmem:[#allocation10 + $0x1] sm:$0x1] %vm78_vm0, %v95_v41  ;;  %v110_v45 = vmul.f32 %v90_v40, %v463_v6  ;;  %v105_v47 = vmul.f32 %v90_v40, %v459_v2  ;;  %v106_v48 = vmul.f32 %v95_v41, %v461_v5 }
  0x4f   :  { %v111_v49 = vmul.f32 %v95_v41, %v465_v7 }
  0x50   :  { %v107_v52 = vadd.f32 %v106_v48, %v105_v47 }
  0x51   :  { %v112_v53 = vadd.f32 %v111_v49, %v110_v45 }
  0x58   :  { %v275_v42 = vpop.eup %274 }
  0x59   :  { %v97_v44 = vmul.f32 %v275_v42, %v95_v41 }
  0x5b   :  { %v102_v46 = vsub.f32 %v101_v43, %v97_v44  ;;  %98 = vst.msk [vmem:[#allocation7 + $0x1] sm:$0x1] %vm78_vm0, %v97_v44 }
  0x5d   :  { %v103_v50 = vmul.f32 %v102_v46, %v467_v9 }
  0x5f   :  { %v104_v51 = vadd.f32 %v103_v50, %v473_v15 }
  0x61   :  { %v108_v54 = vmul.f32 %v104_v51, %v476_v17  ;;  %v113_v55 = vmul.f32 %v104_v51, %v478_v18  ;;  %v177_v51 = vld [vmem:[#allocation6 + $0x6] sm:$0x1] }
  0x63   :  { %v109_v56 = vadd.f32 %v108_v54, %v107_v52  ;;  %v114_v57 = vadd.f32 %v113_v55, %v112_v53 }
  0x65   :  { %276 = vrcp.f32 %v109_v56  ;;  %118 = vst.msk [vmem:[#allocation8 + $0x2] sm:$0x1] %vm78_vm0, %v109_v56  ;;  %119 = vst.msk [vmem:[#allocation10 + $0x2] sm:$0x1] %vm78_vm0, %v114_v57  ;;  %v129_v61 = vmul.f32 %v109_v56, %v463_v6  ;;  %v124_v63 = vmul.f32 %v109_v56, %v459_v2  ;;  %v125_v0 = vmul.f32 %v114_v57, %v461_v5 }
  0x66   :  { %v130_v1 = vmul.f32 %v114_v57, %v465_v7 }
  0x67   :  { %v126_v8 = vadd.f32 %v125_v0, %v124_v63 }
  0x68   :  { %v131_v10 = vadd.f32 %v130_v1, %v129_v61 }
  0x6f   :  { %v277_v58 = vpop.eup %276 }
  0x70   :  { %v116_v60 = vmul.f32 %v277_v58, %v114_v57 }
  0x72   :  { %v121_v62 = vsub.f32 %v120_v59, %v116_v60  ;;  %117 = vst.msk [vmem:[#allocation7 + $0x2] sm:$0x1] %vm78_vm0, %v116_v60 }
  0x74   :  { %v122_v3 = vmul.f32 %v121_v62, %v467_v9 }
  0x76   :  { %v123_v4 = vadd.f32 %v122_v3, %v473_v15 }
  0x78   :  { %v127_v11 = vmul.f32 %v123_v4, %v476_v17  ;;  %v132_v12 = vmul.f32 %v123_v4, %v478_v18  ;;  %v196_v4 = vld [vmem:[#allocation6 + $0x7] sm:$0x1] }
  0x7a   :  { %v128_v13 = vadd.f32 %v127_v11, %v126_v8  ;;  %v133_v14 = vadd.f32 %v132_v12, %v131_v10 }
  0x7c   :  { %278 = vrcp.f32 %v128_v13  ;;  %137 = vst.msk [vmem:[#allocation8 + $0x3] sm:$0x1] %vm78_vm0, %v128_v13  ;;  %138 = vst.msk [vmem:[#allocation10 + $0x3] sm:$0x1] %vm78_vm0, %v133_v14  ;;  %v148_v21 = vmul.f32 %v128_v13, %v463_v6  ;;  %v143_v23 = vmul.f32 %v128_v13, %v459_v2  ;;  %v144_v24 = vmul.f32 %v133_v14, %v461_v5 }
  0x7d   :  { %v149_v25 = vmul.f32 %v133_v14, %v465_v7 }
  0x7e   :  { %v145_v28 = vadd.f32 %v144_v24, %v143_v23 }
  0x7f   :  { %v150_v29 = vadd.f32 %v149_v25, %v148_v21 }
  0x86   :  { %v279_v16 = vpop.eup %278 }
  0x87   :  { %v135_v20 = vmul.f32 %v279_v16, %v133_v14 }
  0x89   :  { %v140_v22 = vsub.f32 %v139_v19, %v135_v20  ;;  %136 = vst.msk [vmem:[#allocation7 + $0x3] sm:$0x1] %vm78_vm0, %v135_v20 }
  0x8b   :  { %v141_v26 = vmul.f32 %v140_v22, %v467_v9 }
  0x8d   :  { %v142_v27 = vadd.f32 %v141_v26, %v473_v15 }
  0x8f   :  { %v146_v30 = vmul.f32 %v142_v27, %v476_v17  ;;  %v151_v31 = vmul.f32 %v142_v27, %v478_v18 }
  0x91   :  { %v147_v32 = vadd.f32 %v146_v30, %v145_v28  ;;  %v152_v33 = vadd.f32 %v151_v31, %v150_v29 }
  0x93   :  { %280 = vrcp.f32 %v147_v32  ;;  %156 = vst.msk [vmem:[#allocation8 + $0x4] sm:$0x1] %vm78_vm0, %v147_v32  ;;  %157 = vst.msk [vmem:[#allocation10 + $0x4] sm:$0x1] %vm78_vm0, %v152_v33  ;;  %v167_v37 = vmul.f32 %v147_v32, %v463_v6  ;;  %v162_v39 = vmul.f32 %v147_v32, %v459_v2  ;;  %v163_v40 = vmul.f32 %v152_v33, %v461_v5 }
  0x94   :  { %v168_v41 = vmul.f32 %v152_v33, %v465_v7 }
  0x95   :  { %v164_v44 = vadd.f32 %v163_v40, %v162_v39 }
  0x96   :  { %v169_v45 = vadd.f32 %v168_v41, %v167_v37 }
  0x9d   :  { %v281_v34 = vpop.eup %280 }
  0x9e   :  { %v154_v36 = vmul.f32 %v281_v34, %v152_v33 }
  0xa0   :  { %v159_v38 = vsub.f32 %v158_v35, %v154_v36  ;;  %155 = vst.msk [vmem:[#allocation7 + $0x4] sm:$0x1] %vm78_vm0, %v154_v36 }
  0xa2   :  { %v160_v42 = vmul.f32 %v159_v38, %v467_v9 }
  0xa4   :  { %v161_v43 = vadd.f32 %v160_v42, %v473_v15 }
  0xa6   :  { %v165_v46 = vmul.f32 %v161_v43, %v476_v17  ;;  %v170_v47 = vmul.f32 %v161_v43, %v478_v18 }
  0xa8   :  { %v166_v48 = vadd.f32 %v165_v46, %v164_v44  ;;  %v171_v49 = vadd.f32 %v170_v47, %v169_v45 }
  0xaa   :  { %282 = vrcp.f32 %v166_v48  ;;  %175 = vst.msk [vmem:[#allocation8 + $0x5] sm:$0x1] %vm78_vm0, %v166_v48  ;;  %176 = vst.msk [vmem:[#allocation10 + $0x5] sm:$0x1] %vm78_vm0, %v171_v49  ;;  %v186_v53 = vmul.f32 %v166_v48, %v463_v6  ;;  %v181_v55 = vmul.f32 %v166_v48, %v459_v2  ;;  %v182_v56 = vmul.f32 %v171_v49, %v461_v5 }
  0xab   :  { %v187_v57 = vmul.f32 %v171_v49, %v465_v7 }
  0xac   :  { %v183_v60 = vadd.f32 %v182_v56, %v181_v55 }
  0xad   :  { %v188_v61 = vadd.f32 %v187_v57, %v186_v53 }
  0xb4   :  { %v283_v50 = vpop.eup %282 }
  0xb5   :  { %v173_v52 = vmul.f32 %v283_v50, %v171_v49 }
  0xb7   :  { %v178_v54 = vsub.f32 %v177_v51, %v173_v52  ;;  %174 = vst.msk [vmem:[#allocation7 + $0x5] sm:$0x1] %vm78_vm0, %v173_v52 }
  0xb9   :  { %v179_v58 = vmul.f32 %v178_v54, %v467_v9 }
  0xbb   :  { %v180_v59 = vadd.f32 %v179_v58, %v473_v15 }
  0xbd   :  { %v184_v62 = vmul.f32 %v180_v59, %v476_v17  ;;  %v189_v63 = vmul.f32 %v180_v59, %v478_v18 }
  0xbf   :  { %v185_v0 = vadd.f32 %v184_v62, %v183_v60  ;;  %v190_v1 = vadd.f32 %v189_v63, %v188_v61 }
  0xc1   :  { %284 = vrcp.f32 %v185_v0  ;;  %194 = vst.msk [vmem:[#allocation8 + $0x6] sm:$0x1] %vm78_vm0, %v185_v0  ;;  %195 = vst.msk [vmem:[#allocation10 + $0x6] sm:$0x1] %vm78_vm0, %v190_v1  ;;  %v200_v10 = vmul.f32 %v185_v0, %v459_v2  ;;  %v201_v12 = vmul.f32 %v190_v1, %v461_v5  ;;  %v205_v13 = vmul.f32 %v185_v0, %v463_v6 }
  0xc2   :  { %v206_v14 = vmul.f32 %v190_v1, %v465_v7 }
  0xc3   :  { %v202_v20 = vadd.f32 %v201_v12, %v200_v10 }
  0xc4   :  { %v207_v21 = vadd.f32 %v206_v14, %v205_v13 }
  0xcb   :  { %v285_v3 = vpop.eup %284 }
  0xcc   :  { %v192_v8 = vmul.f32 %v285_v3, %v190_v1 }
  0xce   :  { %v197_v11 = vsub.f32 %v196_v4, %v192_v8  ;;  %193 = vst.msk [vmem:[#allocation7 + $0x6] sm:$0x1] %vm78_vm0, %v192_v8 }
  0xd0   :  { %v198_v16 = vmul.f32 %v197_v11, %v467_v9 }
  0xd2   :  { %v199_v19 = vadd.f32 %v198_v16, %v473_v15 }
  0xd4   :  { %v203_v22 = vmul.f32 %v199_v19, %v476_v17  ;;  %v208_v2 = vmul.f32 %v199_v19, %v478_v18 }
  0xd6   :  { %v204_v5 = vadd.f32 %v203_v22, %v202_v20  ;;  %v209_v23 = vadd.f32 %v208_v2, %v207_v21 }
  0xd8   :  { %286 = vrcp.f32 %v204_v5  ;;  %213 = vst.msk [vmem:[#allocation8 + $0x7] sm:$0x1] %vm78_vm0, %v204_v5  ;;  %214 = vst.msk [vmem:[#allocation10 + $0x7] sm:$0x1] %vm78_vm0, %v209_v23 }
  0xd9   :  { %331 = shalt.err (!%p328_p1)
}
  0xda   :  { %s332_s6 = scalar_lea.hbm %s610_s4, 128 }
  0xdb   :  { %p333_p2 = scmp.ne.s32.totalorder %s610_s4, %s332_s6  ;;  %p336_p3 = scmp.lt.u32.totalorder %s332_s6, %s610_s4 }
  0xdd   :  { %p338_p4 = pnand %p336_p3, %p333_p2 }
  0xdf   :  { %341 = shalt.err (!%p338_p4)
}
  0xe0   :  { %234 = dma.vmem_to_hbm [thread:$0]  %s232_s25, 128, %s610_s4, [#allocation9]  }
  0xe1   :  { %s342_s0 = scalar_lea.vmem %s560_s27, 128  ;;  %p347_p6 = scmp.lt.s32.totalorder %s560_s27, %s560_s27 }
  0xe2   :  { %p343_p5 = scmp.ne.s32.totalorder %s560_s27, %s342_s0  ;;  %p348_p7 = scmp.lt.s32.totalorder %s342_s0, %s342_s0 }
  0xe4   :  { %p349_p8 = por %p348_p7, %p347_p6 }
  0xe6   :  { %p350_p9 = pnand %p349_p8, %p343_p5 }
  0xe8   :  { %353 = shalt.err (!%p350_p9)
}
  0xe9   :  { %s354_s15 = scalar_lea.hbm %s611_s5, 128 }
  0xea   :  { %p355_p10 = scmp.ne.s32.totalorder %s611_s5, %s354_s15  ;;  %p358_p11 = scmp.lt.u32.totalorder %s354_s15, %s611_s5 }
  0xec   :  { %p360_p12 = pnand %p358_p11, %p355_p10 }
  0xee   :  { %363 = shalt.err (!%p360_p12)
}
  0xef   :  { %244 = dma.vmem_to_hbm [thread:$0]  %s560_s27, 128, %s611_s5, [#allocation9]   ;;  %v287_v6 = vpop.eup %286 }
  0xf0   :  { %s398_s21 = smov [#allocation7]   ;;  %v211_v7 = vmul.f32 %v287_v6, %v209_v23 }
  0xf1   :  { %s221_s22 = sshll.u32 %s398_s21, 4  ;;  %s222_s22 = int_to_ptr.vmem [resolvable:$true] %s221_s22 }
  0xf2   :  { %212 = vst.msk [vmem:[#allocation7 + $0x7] sm:$0x1] %vm78_vm0, %v211_v7  ;;  %s364_s23 = scalar_lea.vmem %s222_s22, 128  ;;  %p369_p0 = scmp.lt.s32.totalorder %s222_s22, %s222_s22 }
  0xf3   :  { %p365_p13 = scmp.ne.s32.totalorder %s222_s22, %s364_s23  ;;  %p370_p1 = scmp.lt.s32.totalorder %s364_s23, %s364_s23 }
  0xf5   :  { %p371_p2 = por %p370_p1, %p369_p0 }
  0xf7   :  { %p372_p3 = pnand %p371_p2, %p365_p13 }
  0xf9   :  { %375 = shalt.err (!%p372_p3)
}
  0xfa   :  { %s376_s1 = scalar_lea.hbm %s609_s3, 128 }
  0xfb   :  { %p377_p4 = scmp.ne.s32.totalorder %s609_s3, %s376_s1  ;;  %p380_p5 = scmp.lt.u32.totalorder %s376_s1, %s609_s3 }
  0xfd   :  { %p382_p6 = pnand %p380_p5, %p377_p4 }
  0xff   :  { %385 = shalt.err (!%p382_p6)
}
 0x100   :  { %224 = dma.vmem_to_hbm [thread:$0]  %s222_s22, 128, %s609_s3, [#allocation4]  }
 0x101   :  { %390 = dma.done.wait [#allocation4], 128  }
 0x102   :  { %391 = vsyncadd [#allocation4], 4294967168 }
 0x103   :  { %392 = dma.done.wait [#allocation9], 256  }
 0x104   :  { %393 = vsyncadd [#allocation9], 4294967040 }
 0x105   :  { %254 = vsyncpa [#allocation3], 1 }
 0x106   :  { %255 = vsyncpa [#allocation4], 1 }
 0x107   :  { %256 = vsyncpa [#allocation9], 1 }
 0x108   :  { %257 = vsyncpa [#allocation5], 1 }

</bundles_post_ra>
